<compile_context>
chip_gen: v7x
topology: tpu7x:2x2x1
jax: 0.10.0
libtpu: 0.0.40
codegen_flags: <defaults>
</compile_context>

<pallas_src>
import functools

import jax
import jax.numpy as jnp
from jax import lax
from jax.experimental import pallas as pl
from jax.experimental.pallas import tpu as pltpu

_LANE = 128
_BLOCK_BYTES = 2 * 1024 * 1024     # ~2 MiB per input block (per pipeline buffer)
_CHUNK_ROWS = 256                  # inner-loop chunk; bounds in-kernel temporaries


def _accum_chunk(recon_ref, target_ref, r0, cnt, carry):
    """Adds one (cnt, 128) row-chunk's partial sums into the (8,128) carries."""
    az, at, ac = carry
    t = target_ref[pl.ds(r0, cnt), :].astype(jnp.float32)
    r = recon_ref[pl.ds(r0, cnt), :].astype(jnp.float32)
    d = r - t
    sq = d * d
    z = t == 0.0
    nsub = cnt // 8
    # (cnt,128)->(cnt/8,8,128) regroups whole vregs; sum(axis=0) is a pure
    # VALU vreg-tree add (no cross-lane/sublane XLU work, no per-elem acc RMW).
    az = az + jnp.sum(jnp.where(z, sq, 0.0).reshape(nsub, 8, _LANE), axis=0)
    at = at + jnp.sum(sq.reshape(nsub, 8, _LANE), axis=0)
    ac = ac + jnp.sum(jnp.where(z, 1.0, 0.0).reshape(nsub, 8, _LANE), axis=0)
    return az, at, ac


def _split_sums_kernel(recon_ref, target_ref, out_ref, acc_ref, *,
                       tm, steps, chunk_rows):
    """Per shard: accumulate [sum_sq_zero, sum_sq_total, count_zero] lane partials."""
    j = pl.program_id(1)   # reduction axis ("arbitrary")

    @pl.when(j == 0)
    def _init():
        acc_ref[...] = jnp.zeros_like(acc_ref)

    zero8 = jnp.zeros((8, _LANE), jnp.float32)
    carry = (zero8, zero8, zero8)

    nfull = tm // chunk_rows
    rem = tm - nfull * chunk_rows

    if nfull > 0:
        def body(i, c):
            r0 = pl.multiple_of(i * chunk_rows, chunk_rows)
            return _accum_chunk(recon_ref, target_ref, r0, chunk_rows, c)
        carry = lax.fori_loop(0, nfull, body, carry)
    if rem > 0:
        carry = _accum_chunk(recon_ref, target_ref, nfull * chunk_rows, rem, carry)

    # One vreg of accumulator RMW per quantity per grid step.
    acc_ref[0] += carry[0]
    acc_ref[1] += carry[1]
    acc_ref[2] += carry[2]

    @pl.when(j == steps - 1)
    def _finalize():
        out_ref[0] = acc_ref[...]


def _partial_sums_jax(recon, target):
    """Pure-JAX partial sums for the (small) remainder not covered by the grid."""
    r = recon.astype(jnp.float32)
    t = target.astype(jnp.float32)
    sq = (r - t) ** 2
    z = t == 0.0
    return (jnp.sum(jnp.where(z, sq, 0.0)),
            jnp.sum(sq),
            jnp.sum(z.astype(jnp.float32)))


def _tensorcores_per_chip():
    # v7x parts have 2 TensorCores per chip; v5e/v6e have 1. Conservative default 1.
    # TODO(synk): verify on v7x (xprof) that "parallel" actually shards the
    # leading grid axis across both TCs; otherwise switch to pltpu.CORE_PARALLEL.
    try:
        kind = jax.devices()[0].device_kind.lower()
    except Exception:
        return 1
    return 2 if ("v7" in kind or "7x" in kind) else 1


@jax.jit
def ada_weighted_split_loss(reconstructed_image, target_image,
                            zero_weighting=1.0, nonzero_weighting=1.0):
    recon = reconstructed_image.reshape(-1)
    target = target_image.reshape(-1)

    # Keep f32/bf16 inputs native (bf16 halves HBM read bytes); otherwise f32.
    native_ok = (recon.dtype == target.dtype and
                 recon.dtype in (jnp.dtype(jnp.float32), jnp.dtype(jnp.bfloat16)))
    if not native_ok:
        recon = recon.astype(jnp.float32)
        target = target.astype(jnp.float32)

    n = recon.shape[0]
    itemsize = recon.dtype.itemsize
    sublane_pack = 8 * (4 // itemsize)            # 8 (f32) / 16 (bf16)
    tm_max = _BLOCK_BYTES // (_LANE * itemsize)   # 4096 (f32) / 8192 (bf16)

    rows_total = n // _LANE
    hw_shards = _tensorcores_per_chip()

    # Balance blocks at ~tm_max rows each; round the block count so the shard
    # axis splits evenly. Whatever the grid does not cover goes to the epilogue.
    num_blocks = max(1, (rows_total + tm_max - 1) // tm_max)
    if hw_shards > 1 and num_blocks >= hw_shards:
        num_blocks = ((num_blocks + hw_shards - 1) // hw_shards) * hw_shards
    tm = (rows_total // num_blocks) // sublane_pack * sublane_pack

    sum_sq_zero = jnp.float32(0.0)
    sum_sq_total = jnp.float32(0.0)
    count_zero = jnp.float32(0.0)
    n_main = 0

    if tm > 0:
        if hw_shards > 1 and num_blocks >= hw_shards and num_blocks % hw_shards == 0:
            num_shards = hw_shards
        else:
            num_shards = 1
        steps = num_blocks // num_shards
        rows_kernel = num_blocks * tm
        n_main = rows_kernel * _LANE

        n_lanes = rows_total * _LANE
        if n_lanes == n:
            recon2d = recon.reshape(rows_total, _LANE)      # copy-free reshape
            target2d = target.reshape(rows_total, _LANE)
        else:
            # TODO(synk): ragged (n % 128 != 0) sizes pay one prefix-slice copy;
            # the common lane-aligned case reshapes with zero extra HBM traffic.
            recon2d = recon[:n_lanes].reshape(rows_total, _LANE)
            target2d = target[:n_lanes].reshape(rows_total, _LANE)

        kernel = functools.partial(_split_sums_kernel, tm=tm, steps=steps,
                                   chunk_rows=_CHUNK_ROWS)

        def in_map(s, j):
            return (s * steps + j, 0)

        out = pl.pallas_call(
            kernel,
            out_shape=jax.ShapeDtypeStruct((num_shards, 3, 8, _LANE), jnp.float32),
            grid=(num_shards, steps),
            in_specs=[pl.BlockSpec((tm, _LANE), in_map),
                      pl.BlockSpec((tm, _LANE), in_map)],
            out_specs=pl.BlockSpec((1, 3, 8, _LANE), lambda s, j: (s, 0, 0, 0)),
            scratch_shapes=[pltpu.VMEM((3, 8, _LANE), jnp.float32)],
            compiler_params=pltpu.CompilerParams(
                dimension_semantics=("parallel", "arbitrary")),
            cost_estimate=pl.CostEstimate(
                flops=8 * n_main,
                transcendentals=0,
                bytes_accessed=2 * n_main * itemsize),
        )(recon2d, target2d)

        partials = jnp.sum(out, axis=(0, 2, 3))   # (3,)
        sum_sq_zero = partials[0]
        sum_sq_total = partials[1]
        count_zero = partials[2]

    if n_main < n:
        # Remainder not covered by the kernel grid (< one block + sub-lane
        # tail); a small fused XLA masked reduction.
        tz, tt, tc = _partial_sums_jax(recon[n_main:], target[n_main:])
        sum_sq_zero = sum_sq_zero + tz
        sum_sq_total = sum_sq_total + tt
        count_zero = count_zero + tc

    count_nonzero = jnp.float32(n) - count_zero
    sum_sq_nonzero = sum_sq_total - sum_sq_zero

    # torch: NaN (empty-mask mean) replaced by 0.
    zero_loss = jnp.where(count_zero > 0,
                          sum_sq_zero / jnp.maximum(count_zero, 1.0), 0.0)
    nonzero_loss = jnp.where(count_nonzero > 0,
                             sum_sq_nonzero / jnp.maximum(count_nonzero, 1.0), 0.0)

    zw = jnp.asarray(zero_weighting, jnp.float32)
    nw = jnp.asarray(nonzero_weighting, jnp.float32)
    return zw * zero_loss + nw * nonzero_loss


def _reference(recon, target, zw=1.0, nw=1.0):
    """Pure-JAX reference mirroring the PyTorch forward (MSE split losses)."""
    recon = recon.astype(jnp.float32)
    target = target.astype(jnp.float32)
    diff_sq = (recon - target) ** 2
    zero_mask = target == 0
    nz_mask = ~zero_mask
    cz = jnp.sum(zero_mask)
    cnz = jnp.sum(nz_mask)
    zl = jnp.where(cz > 0,
                   jnp.sum(jnp.where(zero_mask, diff_sq, 0.0)) / jnp.maximum(cz, 1),
                   0.0)
    nzl = jnp.where(cnz > 0,
                    jnp.sum(jnp.where(nz_mask, diff_sq, 0.0)) / jnp.maximum(cnz, 1),
                    0.0)
    return zw * zl + nw * nzl


def _make_inputs(key, shape):
    k1, k2, k3 = jax.random.split(key, 3)
    target = jax.random.normal(k1, shape, dtype=jnp.float32)
    sparsity = jax.random.bernoulli(k2, 0.6, shape)   # realistic zero fraction
    target = jnp.where(sparsity, 0.0, target)
    recon = jax.random.normal(k3, shape, dtype=jnp.float32)
    return recon, target


if __name__ == "__main__":
    key = jax.random.PRNGKey(0)
    k_small, k_big, k_ragged = jax.random.split(key, 3)

    # Primary case: NCHW as in the PyTorch module.
    recon, target = _make_inputs(k_small, (2, 4, 16, 16))
    loss = jax.block_until_ready(
        ada_weighted_split_loss(recon, target,
                                zero_weighting=1.0, nonzero_weighting=1.0))
    ref = _reference(recon, target, 1.0, 1.0)
    assert jnp.allclose(loss, ref, rtol=1e-4, atol=1e-6), (loss, ref)

    # Multi-step grid + in-kernel chunk loop (also exercises non-unit weights).
    recon_b, target_b = _make_inputs(k_big, (2, 4, 288, 256))
    loss_b = jax.block_until_ready(
        ada_weighted_split_loss(recon_b, target_b,
                                zero_weighting=0.7, nonzero_weighting=1.3))
    ref_b = _reference(recon_b, target_b, 0.7, 1.3)
    assert jnp.allclose(loss_b, ref_b, rtol=1e-4, atol=1e-6), (loss_b, ref_b)

    # Ragged size: lane-unaligned tail handled in the host epilogue.
    recon_r, target_r = _make_inputs(k_ragged, (2, 3, 17, 19))
    loss_r = jax.block_until_ready(
        ada_weighted_split_loss(recon_r, target_r,
                                zero_weighting=2.0, nonzero_weighting=0.5))
    ref_r = _reference(recon_r, target_r, 2.0, 0.5)
    assert jnp.allclose(loss_r, ref_r, rtol=1e-4, atol=1e-6), (loss_r, ref_r)

    print("KERNEL_OK")
</pallas_src>

<mosaic_0001>
module attributes {stable_mosaic.version = 11 : i64} {
  func.func @_split_sums_kernel(%arg0: i32, %arg1: i32, %arg2: memref<16x128xf32, #tpu.memory_space<vmem>>, %arg3: memref<16x128xf32, #tpu.memory_space<vmem>>, %arg4: memref<1x3x8x128xf32, #tpu.memory_space<vmem>>, %arg5: memref<3x8x128xf32, #tpu.memory_space<vmem>>) attributes {dimension_semantics = [#tpu.dimension_semantics<parallel>, #tpu.dimension_semantics<arbitrary>], iteration_bounds = array<i64: 1, 1>, scalar_prefetch = 0 : i64, scratch_operands = 1 : i64, tpu.core_type = #tpu.core_type<tc>, window_params = [{transform_indices = @transform_0, window_bounds = array<i64: 16, 128>}, {transform_indices = @transform_1, window_bounds = array<i64: 16, 128>}, {transform_indices = @transform_2, window_bounds = array<i64: 1, 3, 8, 128>}]} {
    %c0_i32 = arith.constant 0 : i32
    %0 = arith.cmpi eq, %arg1, %c0_i32 : i32
    %1 = arith.extui %0 : i1 to i32
    %c0_i32_0 = arith.constant 0 : i32
    %2 = arith.cmpi ne, %1, %c0_i32_0 : i32
    scf.if %2 {
      %cst_29 = arith.constant 0.000000e+00 : f32
      %45 = vector.broadcast %cst_29 : f32 to vector<3x8x128xf32>
      %c0_30 = arith.constant 0 : index
      %c0_31 = arith.constant 0 : index
      %c0_32 = arith.constant 0 : index
      %46 = vector.load %arg5[%c0_30, %c0_31, %c0_32] : memref<3x8x128xf32, #tpu.memory_space<vmem>>, vector<3x8x128xf32>
      tpu.vector_store %arg5[%c0_30, %c0_31, %c0_32], %45 {strides = array<i32>} : memref<3x8x128xf32, #tpu.memory_space<vmem>>, vector<3x8x128xf32>,
    } else {
    }
    %cst = arith.constant 0.000000e+00 : f32
    %3 = vector.broadcast %cst : f32 to vector<8x128xf32>
    %c0 = arith.constant 0 : index
    %c0_1 = arith.constant 0 : index
    %4 = vector.load %arg3[%c0, %c0_1] : memref<16x128xf32, #tpu.memory_space<vmem>>, vector<16x128xf32>
    %c0_2 = arith.constant 0 : index
    %c0_3 = arith.constant 0 : index
    %5 = vector.load %arg2[%c0_2, %c0_3] : memref<16x128xf32, #tpu.memory_space<vmem>>, vector<16x128xf32>
    %6 = arith.subf %5, %4 : vector<16x128xf32>
    %7 = arith.mulf %6, %6 : vector<16x128xf32>
    %cst_4 = arith.constant 0.000000e+00 : f32
    %8 = vector.broadcast %cst_4 : f32 to vector<16x128xf32>
    %9 = arith.cmpf oeq, %4, %8 : vector<16x128xf32>
    %cst_5 = arith.constant 0.000000e+00 : f32
    %10 = vector.broadcast %cst_5 : f32 to vector<16x128xf32>
    %11 = arith.select %9, %7, %10 : vector<16x128xi1>, vector<16x128xf32>
    %12 = vector.shape_cast %11 : vector<16x128xf32> to vector<2x8x128xf32>
    %cst_6 = arith.constant dense<0.000000e+00> : vector<8x128xf32>
    %13 = vector.multi_reduction <add>, %12, %cst_6 [0] : vector<2x8x128xf32> to vector<8x128xf32>
    %14 = arith.addf %3, %13 : vector<8x128xf32>
    %15 = vector.shape_cast %7 : vector<16x128xf32> to vector<2x8x128xf32>
    %cst_7 = arith.constant dense<0.000000e+00> : vector<8x128xf32>
    %16 = vector.multi_reduction <add>, %15, %cst_7 [0] : vector<2x8x128xf32> to vector<8x128xf32>
    %17 = arith.addf %3, %16 : vector<8x128xf32>
    %cst_8 = arith.constant 1.000000e+00 : f32
    %cst_9 = arith.constant 0.000000e+00 : f32
    %18 = vector.broadcast %cst_8 : f32 to vector<16x128xf32>
    %19 = vector.broadcast %cst_9 : f32 to vector<16x128xf32>
    %20 = arith.select %9, %18, %19 : vector<16x128xi1>, vector<16x128xf32>
    %21 = vector.shape_cast %20 : vector<16x128xf32> to vector<2x8x128xf32>
    %cst_10 = arith.constant dense<0.000000e+00> : vector<8x128xf32>
    %22 = vector.multi_reduction <add>, %21, %cst_10 [0] : vector<2x8x128xf32> to vector<8x128xf32>
    %23 = arith.addf %3, %22 : vector<8x128xf32>
    %c0_11 = arith.constant 0 : index
    %c0_12 = arith.constant 0 : index
    %c0_13 = arith.constant 0 : index
    %24 = vector.load %arg5[%c0_11, %c0_12, %c0_13] : memref<3x8x128xf32, #tpu.memory_space<vmem>>, vector<1x8x128xf32>
    %25 = vector.shape_cast %24 : vector<1x8x128xf32> to vector<8x128xf32>
    %26 = arith.addf %25, %14 : vector<8x128xf32>
    %c0_14 = arith.constant 0 : index
    %c0_15 = arith.constant 0 : index
    %c0_16 = arith.constant 0 : index
    %27 = vector.load %arg5[%c0_14, %c0_15, %c0_16] : memref<3x8x128xf32, #tpu.memory_space<vmem>>, vector<1x8x128xf32>
    %28 = vector.shape_cast %27 : vector<1x8x128xf32> to vector<8x128xf32>
    %29 = vector.shape_cast %26 : vector<8x128xf32> to vector<1x8x128xf32>
    tpu.vector_store %arg5[%c0_14, %c0_15, %c0_16], %29 {strides = array<i32>} : memref<3x8x128xf32, #tpu.memory_space<vmem>>, vector<1x8x128xf32>,
    %c1 = arith.constant 1 : index
    %c0_17 = arith.constant 0 : index
    %c0_18 = arith.constant 0 : index
    %30 = vector.load %arg5[%c1, %c0_17, %c0_18] : memref<3x8x128xf32, #tpu.memory_space<vmem>>, vector<1x8x128xf32>
    %31 = vector.shape_cast %30 : vector<1x8x128xf32> to vector<8x128xf32>
    %32 = arith.addf %31, %17 : vector<8x128xf32>
    %c1_19 = arith.constant 1 : index
    %c0_20 = arith.constant 0 : index
    %c0_21 = arith.constant 0 : index
    %33 = vector.load %arg5[%c1_19, %c0_20, %c0_21] : memref<3x8x128xf32, #tpu.memory_space<vmem>>, vector<1x8x128xf32>
    %34 = vector.shape_cast %33 : vector<1x8x128xf32> to vector<8x128xf32>
    %35 = vector.shape_cast %32 : vector<8x128xf32> to vector<1x8x128xf32>
    tpu.vector_store %arg5[%c1_19, %c0_20, %c0_21], %35 {strides = array<i32>} : memref<3x8x128xf32, #tpu.memory_space<vmem>>, vector<1x8x128xf32>,
    %c2 = arith.constant 2 : index
    %c0_22 = arith.constant 0 : index
    %c0_23 = arith.constant 0 : index
    %36 = vector.load %arg5[%c2, %c0_22, %c0_23] : memref<3x8x128xf32, #tpu.memory_space<vmem>>, vector<1x8x128xf32>
    %37 = vector.shape_cast %36 : vector<1x8x128xf32> to vector<8x128xf32>
    %38 = arith.addf %37, %23 : vector<8x128xf32>
    %c2_24 = arith.constant 2 : index
    %c0_25 = arith.constant 0 : index
    %c0_26 = arith.constant 0 : index
    %39 = vector.load %arg5[%c2_24, %c0_25, %c0_26] : memref<3x8x128xf32, #tpu.memory_space<vmem>>, vector<1x8x128xf32>
    %40 = vector.shape_cast %39 : vector<1x8x128xf32> to vector<8x128xf32>
    %41 = vector.shape_cast %38 : vector<8x128xf32> to vector<1x8x128xf32>
    tpu.vector_store %arg5[%c2_24, %c0_25, %c0_26], %41 {strides = array<i32>} : memref<3x8x128xf32, #tpu.memory_space<vmem>>, vector<1x8x128xf32>,
    %c0_i32_27 = arith.constant 0 : i32
    %42 = arith.cmpi eq, %arg1, %c0_i32_27 : i32
    %43 = arith.extui %42 : i1 to i32
    %c0_i32_28 = arith.constant 0 : i32
    %44 = arith.cmpi ne, %43, %c0_i32_28 : i32
    scf.if %44 {
      %c0_29 = arith.constant 0 : index
      %c0_30 = arith.constant 0 : index
      %c0_31 = arith.constant 0 : index
      %45 = vector.load %arg5[%c0_29, %c0_30, %c0_31] : memref<3x8x128xf32, #tpu.memory_space<vmem>>, vector<3x8x128xf32>
      %c0_32 = arith.constant 0 : index
      %c0_33 = arith.constant 0 : index
      %c0_34 = arith.constant 0 : index
      %c0_35 = arith.constant 0 : index
      %46 = vector.load %arg4[%c0_32, %c0_33, %c0_34, %c0_35] : memref<1x3x8x128xf32, #tpu.memory_space<vmem>>, vector<1x3x8x128xf32>
      %47 = vector.shape_cast %46 : vector<1x3x8x128xf32> to vector<3x8x128xf32>
      %48 = vector.shape_cast %45 : vector<3x8x128xf32> to vector<1x3x8x128xf32>
      tpu.vector_store %arg4[%c0_32, %c0_33, %c0_34, %c0_35], %48 {strides = array<i32>} : memref<1x3x8x128xf32, #tpu.memory_space<vmem>>, vector<1x3x8x128xf32>,
    } else {
    }
    return
  }
  func.func @transform_0(%arg0: i32, %arg1: i32) -> (i32, i32) {
    %c1_i32 = arith.constant 1 : i32
    %0 = arith.muli %arg0, %c1_i32 : i32
    %1 = arith.addi %0, %arg1 : i32
    %c0_i32 = arith.constant 0 : i32
    %c0_i32_0 = arith.constant 0 : i32
    return %1, %c0_i32 : i32, i32
  }
  func.func @transform_1(%arg0: i32, %arg1: i32) -> (i32, i32) {
    %c1_i32 = arith.constant 1 : i32
    %0 = arith.muli %arg0, %c1_i32 : i32
    %1 = arith.addi %0, %arg1 : i32
    %c0_i32 = arith.constant 0 : i32
    %c0_i32_0 = arith.constant 0 : i32
    return %1, %c0_i32 : i32, i32
  }
  func.func @transform_2(%arg0: i32, %arg1: i32) -> (i32, i32, i32, i32) {
    %c0_i32 = arith.constant 0 : i32
    %c0_i32_0 = arith.constant 0 : i32
    %c0_i32_1 = arith.constant 0 : i32
    %c0_i32_2 = arith.constant 0 : i32
    return %arg0, %c0_i32, %c0_i32_0, %c0_i32_1 : i32, i32, i32, i32
  }
}

</mosaic_0001>

<bundles_post_ra>
// kernel: ada_weighted_split_loss.1
= control target key start
LH: loop header
LB: loop body
LE: loop exit
PB: predicated region body
PF: predicated region fallthrough
CT: control target
= control target key end

     0   :  { %v119_v6 = vmov 0.0   ;;  %s156_s0 = inlined_call_operand.vmem [shape: f32[16,128], index: 0, kind: input, shape index: {}]   ;;  %s157_s1 = inlined_call_operand.vmem [shape: f32[16,128], index: 1, kind: input, shape index: {}]   ;;  %s158_s2 = inlined_call_operand.vmem [shape: f32[1,3,8,128], index: 2, kind: output, shape index: {}]  }
   0x1   :  { %v62_v0 = vld [vmem:[%s157_s1] sm:$0xff]  ;;  %v63_v1 = vld [vmem:[%s157_s1 + $0x8] sm:$0xff] }
   0x2   :  { %v64_v2 = vld [vmem:[%s156_s0] sm:$0xff]  ;;  %v65_v3 = vld [vmem:[%s156_s0 + $0x8] sm:$0xff]  ;;  %vm70_vm0 = vcmp.eq.f32.partialorder %v62_v0, 0.0  ;;  %vm71_vm1 = vcmp.eq.f32.partialorder %v63_v1, 0.0 }
   0x3   :  { %v66_v4 = vsub.f32 %v64_v2, %v62_v0  ;;  %v67_v5 = vsub.f32 %v65_v3, %v63_v1  ;;  %v78_v7 = vsel %vm70_vm0, 1.0, %v119_v6  ;;  %v79_v8 = vsel %vm71_vm1, 1.0, %v119_v6 }
   0x4   :  { %v80_v10 = vadd.f32 %v79_v8, %v78_v7 }
   0x5   :  { %v68_v9 = vmul.f32 %v66_v4, %v66_v4  ;;  %v69_v11 = vmul.f32 %v67_v5, %v67_v5 }
   0x6   :  { %101 = vst [vmem:[%s158_s2 + $0x10] sm:$0xff] %v80_v10 }
   0x7   :  { %v72_v12 = vsel %vm70_vm0, %v68_v9, 0.0  ;;  %v73_v13 = vsel %vm71_vm1, %v69_v11, 0.0  ;;  %v76_v14 = vadd.f32 %v69_v11, %v68_v9 }
   0x8   :  { %v74_v15 = vadd.f32 %v73_v13, %v72_v12 }
   0x9   :  { %100 = vst [vmem:[%s158_s2 + $0x8] sm:$0xff] %v76_v14 }
   0xa   :  { %99 = vst [vmem:[%s158_s2] sm:$0xff] %v74_v15 }

</bundles_post_ra>
